<compile_context>
chip_gen: v6e
topology: v6e:2x2x1
jax: 0.10.0
libtpu: 0.0.40
codegen_flags: <defaults>
</compile_context>

<pallas_src>
import functools

import jax
import jax.numpy as jnp
from jax import lax
from jax.experimental import pallas as pl
from jax.experimental.pallas import tpu as pltpu


def _focal_kernel(x_ref, t_ref, a_ref, o_ref, acc_ref, *,
                  gamma, n_total, l_total, bn, tcols, mask_rows, mask_cols):
    i = pl.program_id(0)   # image-block index   ("parallel")
    j = pl.program_id(1)   # column-block index  ("arbitrary", accumulated)

    @pl.when(j == 0)
    def _():
        acc_ref[...] = jnp.zeros_like(acc_ref)

    x = x_ref[...].astype(jnp.float32)        # (BN, C, TC)  classes on sublanes
    t = t_ref[...]                            # (BN, 1, TC)  int32 targets
    alpha = a_ref[...].astype(jnp.float32)    # (1,  C, 1)   per-class weights

    # numerically-stable log-softmax over the class (sublane) axis
    m = jnp.max(x, axis=1, keepdims=True)                       # (BN,1,TC)
    z = x - m
    lse = jnp.log(jnp.sum(jnp.exp(z), axis=1, keepdims=True))   # (BN,1,TC)

    # gather logpt / alpha at the target class via a one-hot mask (VPU)
    cls_ids = lax.broadcasted_iota(jnp.int32, x.shape, 1)        # (BN,C,TC)
    onehot = (cls_ids == t).astype(jnp.float32)                  # (BN,C,TC)
    logpt = jnp.sum(z * onehot, axis=1, keepdims=True) - lse     # (BN,1,TC)
    pt = jnp.exp(logpt)
    at = jnp.sum(alpha * onehot, axis=1, keepdims=True)          # (BN,1,TC)

    # focal term; special-case small integer gamma (avoids EUP log+exp) and
    # clamp the base so pt rounding slightly above 1 can't produce NaN.
    g = float(gamma)
    if g == 0.0:
        focal = jnp.ones_like(pt)
    else:
        base = jnp.maximum(1.0 - pt, 0.0)
        if g == float(int(g)) and 1 <= int(g) <= 4:
            focal = base
            for _ in range(int(g) - 1):
                focal = focal * base
        else:
            focal = jnp.power(base, g)

    loss = -(focal * (logpt * at))                               # (BN,1,TC)

    # mask ragged last blocks (no jnp.pad of the HBM inputs)
    if mask_rows or mask_cols:
        valid = None
        if mask_rows:
            n_ids = i * bn + lax.broadcasted_iota(jnp.int32, loss.shape, 0)
            valid = n_ids < n_total
        if mask_cols:
            c_ids = j * tcols + lax.broadcasted_iota(jnp.int32, loss.shape, 2)
            cvalid = c_ids < l_total
            valid = cvalid if valid is None else (valid & cvalid)
        loss = jnp.where(valid, loss, 0.0)

    # elementwise vector accumulation; the cross-lane reduce happens once per
    # image-block in the epilogue, not every step.
    acc_ref[...] += loss

    @pl.when(j == pl.num_programs(1) - 1)
    def _():
        total = jnp.sum(acc_ref[...])
        o_ref[...] = jnp.full(o_ref.shape, total, jnp.float32)


def focal_loss(logits, target, *, gamma=0.0, alpha=None, size_average=True,
               tcols_target=2048, vmem_budget_bytes=8 * 1024 * 1024):
    """Pallas focal loss matching the PyTorch FocalLoss.forward semantics.

    logits: (N, C, H, W) (or (M, C)) float logits (f32 or bf16, kept as-is)
    target: integer class ids, shape (N, H, W) (or (M,))
    alpha:  None, a float (-> [alpha, 1-alpha]), or a length-C weight list
    """
    x = jnp.asarray(logits)
    if x.ndim > 2:
        N, C = x.shape[0], x.shape[1]
        x = x.reshape(N, C, -1)                                   # (N, C, L) — free, no transpose
        t = jnp.asarray(target).reshape(N, 1, -1).astype(jnp.int32)
    else:
        M, C = x.shape
        x = jnp.transpose(x, (1, 0)).reshape(1, C, M)             # small 2-D case
        t = jnp.asarray(target).reshape(1, 1, M).astype(jnp.int32)
    N, C, L = x.shape
    n_samples = N * L

    # alpha handling, mirroring the torch module's __init__
    if alpha is None:
        alpha_vec = jnp.ones((1, C, 1), jnp.float32)
    elif isinstance(alpha, (float, int)) and not isinstance(alpha, bool):
        assert C == 2, "scalar alpha implies binary classification (C == 2)"
        alpha_vec = jnp.array([alpha, 1.0 - alpha], jnp.float32).reshape(1, C, 1)
    else:
        alpha_vec = jnp.asarray(alpha, jnp.float32).reshape(1, -1, 1)
        assert alpha_vec.shape[1] == C, "alpha must have one weight per class"

    # Tile selection: largest lane-dense block that fits a conservative VMEM
    # budget (double-buffered input in native dtype + f32 temps + tgt + acc).
    itemsize = jnp.dtype(x.dtype).itemsize
    per_col = 2 * C * itemsize + 6 * C * 4 + 16
    max_cols = max(128, (vmem_budget_bytes // per_col) // 128 * 128)
    target_cols = min(tcols_target, max_cols)
    if L <= target_cols:
        tcols = L                                    # full dim -> always legal
        bn = max(1, min(N, target_cols // max(L, 1)))
    else:
        tcols = target_cols                          # multiple of 128
        bn = 1
    num_i = pl.cdiv(N, bn)
    num_j = pl.cdiv(L, tcols)

    kernel = functools.partial(
        _focal_kernel, gamma=float(gamma), n_total=N, l_total=L,
        bn=bn, tcols=tcols,
        mask_rows=(N % bn != 0), mask_cols=(L % tcols != 0))

    partials = pl.pallas_call(
        kernel,
        out_shape=jax.ShapeDtypeStruct((num_i, 8, 128), jnp.float32),
        grid_spec=pltpu.PrefetchScalarGridSpec(
            num_scalar_prefetch=0,
            grid=(num_i, num_j),
            in_specs=[
                pl.BlockSpec((bn, C, tcols), lambda i, j: (i, 0, j)),  # logits
                pl.BlockSpec((bn, 1, tcols), lambda i, j: (i, 0, j)),  # targets
                pl.BlockSpec((1, C, 1), lambda i, j: (0, 0, 0)),       # alpha (resident)
            ],
            out_specs=pl.BlockSpec((1, 8, 128), lambda i, j: (i, 0, 0)),
            scratch_shapes=[pltpu.VMEM((bn, 1, tcols), jnp.float32)],
        ),
        compiler_params=pltpu.CompilerParams(
            dimension_semantics=("parallel", "arbitrary")),
    )(x, t, alpha_vec)

    total = jnp.sum(partials[:, 0, 0])
    if size_average:
        return total / jnp.float32(n_samples)
    return total


def _focal_loss_ref(logits, target, *, gamma=0.0, alpha=None,
                    size_average=True):
    x = jnp.asarray(logits)
    if x.ndim > 2:
        N, C = x.shape[0], x.shape[1]
        x = jnp.transpose(x.reshape(N, C, -1), (0, 2, 1)).reshape(-1, C)
    t = jnp.asarray(target).reshape(-1)
    logsm = jax.nn.log_softmax(x.astype(jnp.float32), axis=1)
    logpt = jnp.take_along_axis(logsm, t[:, None], axis=1)[:, 0]
    pt = jnp.exp(logpt)
    if alpha is not None:
        a = jnp.asarray(alpha, jnp.float32)
        if a.ndim == 0:
            a = jnp.array([a, 1.0 - a], jnp.float32)
        logpt = logpt * a[t]
    loss = -1.0 * (1.0 - pt) ** gamma * logpt
    return loss.mean() if size_average else loss.sum()


if __name__ == "__main__":
    key = jax.random.PRNGKey(0)
    k1, k2 = jax.random.split(key)

    N, C, H, W = 2, 4, 16, 16
    logits = jax.random.normal(k1, (N, C, H, W), jnp.float32)
    target = jax.random.randint(k2, (N, H, W), 0, C, jnp.int32)

    gamma = 2.0
    alpha = [0.1, 0.2, 0.3, 0.4]   # per-class weights (length C)

    out = focal_loss(logits, target, gamma=gamma, alpha=alpha,
                     size_average=True)
    out = jax.block_until_ready(out)

    ref = _focal_loss_ref(logits, target, gamma=gamma, alpha=alpha,
                          size_average=True)
    assert jnp.allclose(out, ref, rtol=1e-5, atol=1e-5), (out, ref)

    # also exercise the sum / no-alpha / ragged path
    out2 = jax.block_until_ready(
        focal_loss(logits, target, gamma=gamma, alpha=None, size_average=False))
    ref2 = _focal_loss_ref(logits, target, gamma=gamma, alpha=None,
                           size_average=False)
    assert jnp.allclose(out2, ref2, rtol=1e-5, atol=1e-5), (out2, ref2)

    print("KERNEL_OK")
</pallas_src>

<mosaic_0001>
module attributes {stable_mosaic.version = 11 : i64} {
  func.func @_focal_kernel(%arg0: i32, %arg1: i32, %arg2: memref<2x4x256xf32, #tpu.memory_space<vmem>>, %arg3: memref<2x1x256xi32, #tpu.memory_space<vmem>>, %arg4: memref<1x4x1xf32, #tpu.memory_space<vmem>>, %arg5: memref<1x8x128xf32, #tpu.memory_space<vmem>>, %arg6: memref<2x1x256xf32, #tpu.memory_space<vmem>>) attributes {dimension_semantics = [#tpu.dimension_semantics<parallel>, #tpu.dimension_semantics<arbitrary>], iteration_bounds = array<i64: 1, 1>, scalar_prefetch = 0 : i64, scratch_operands = 1 : i64, tpu.core_type = #tpu.core_type<tc>, window_params = [{transform_indices = @transform_0, window_bounds = array<i64: 2, 4, 256>}, {transform_indices = @transform_1, window_bounds = array<i64: 2, 1, 256>}, {pipeline_mode = #tpu.pipeline_mode<synchronous>, transform_indices = @transform_2, window_bounds = array<i64: 1, 4, 1>}, {transform_indices = @transform_3, window_bounds = array<i64: 1, 8, 128>}]} {
    %c0_i32 = arith.constant 0 : i32
    %0 = arith.cmpi eq, %arg1, %c0_i32 : i32
    %1 = arith.extui %0 : i1 to i32
    %c0_i32_0 = arith.constant 0 : i32
    %2 = arith.cmpi ne, %1, %c0_i32_0 : i32
    scf.if %2 {
      %cst_23 = arith.constant 0.000000e+00 : f32
      %43 = vector.broadcast %cst_23 : f32 to vector<2x1x256xf32>
      %c0_24 = arith.constant 0 : index
      %c0_25 = arith.constant 0 : index
      %c0_26 = arith.constant 0 : index
      %44 = vector.load %arg6[%c0_24, %c0_25, %c0_26] : memref<2x1x256xf32, #tpu.memory_space<vmem>>, vector<2x1x256xf32>
      tpu.vector_store %arg6[%c0_24, %c0_25, %c0_26], %43 {strides = array<i32>} : memref<2x1x256xf32, #tpu.memory_space<vmem>>, vector<2x1x256xf32>,
    } else {
    }
    %c0 = arith.constant 0 : index
    %c0_1 = arith.constant 0 : index
    %c0_2 = arith.constant 0 : index
    %3 = vector.load %arg2[%c0, %c0_1, %c0_2] : memref<2x4x256xf32, #tpu.memory_space<vmem>>, vector<2x4x256xf32>
    %c0_3 = arith.constant 0 : index
    %c0_4 = arith.constant 0 : index
    %c0_5 = arith.constant 0 : index
    %4 = vector.load %arg3[%c0_3, %c0_4, %c0_5] : memref<2x1x256xi32, #tpu.memory_space<vmem>>, vector<2x1x256xi32>
    %c0_6 = arith.constant 0 : index
    %c0_7 = arith.constant 0 : index
    %c0_8 = arith.constant 0 : index
    %5 = vector.load %arg4[%c0_6, %c0_7, %c0_8] : memref<1x4x1xf32, #tpu.memory_space<vmem>>, vector<1x4x1xf32>
    %cst = arith.constant dense<0xFF800000> : vector<2x256xf32>
    %6 = vector.multi_reduction <maximumf>, %3, %cst [1] : vector<2x4x256xf32> to vector<2x256xf32>
    %7 = vector.shape_cast %6 : vector<2x256xf32> to vector<2x1x256xf32>
    %8 = vector.broadcast %7 : vector<2x1x256xf32> to vector<2x4x256xf32>
    %9 = arith.subf %3, %8 : vector<2x4x256xf32>
    %10 = math.exp %9 : vector<2x4x256xf32>
    %cst_9 = arith.constant dense<0.000000e+00> : vector<2x256xf32>
    %11 = vector.multi_reduction <add>, %10, %cst_9 [1] : vector<2x4x256xf32> to vector<2x256xf32>
    %12 = vector.shape_cast %11 : vector<2x256xf32> to vector<2x1x256xf32>
    %13 = math.log %12 : vector<2x1x256xf32>
    %14 = tpu.iota {dimensions = array<i32: 1>} : vector<2x4x256xi32>
    %15 = vector.broadcast %4 : vector<2x1x256xi32> to vector<2x4x256xi32>
    %16 = arith.cmpi eq, %14, %15 : vector<2x4x256xi32>
    %17 = arith.extui %16 : vector<2x4x256xi1> to vector<2x4x256xi32>
    %18 = arith.sitofp %17 : vector<2x4x256xi32> to vector<2x4x256xf32>
    %19 = arith.mulf %9, %18 : vector<2x4x256xf32>
    %cst_10 = arith.constant dense<0.000000e+00> : vector<2x256xf32>
    %20 = vector.multi_reduction <add>, %19, %cst_10 [1] : vector<2x4x256xf32> to vector<2x256xf32>
    %21 = vector.shape_cast %20 : vector<2x256xf32> to vector<2x1x256xf32>
    %22 = arith.subf %21, %13 : vector<2x1x256xf32>
    %23 = math.exp %22 : vector<2x1x256xf32>
    %24 = vector.broadcast %5 : vector<1x4x1xf32> to vector<2x4x256xf32>
    %25 = arith.mulf %24, %18 : vector<2x4x256xf32>
    %cst_11 = arith.constant dense<0.000000e+00> : vector<2x256xf32>
    %26 = vector.multi_reduction <add>, %25, %cst_11 [1] : vector<2x4x256xf32> to vector<2x256xf32>
    %27 = vector.shape_cast %26 : vector<2x256xf32> to vector<2x1x256xf32>
    %cst_12 = arith.constant 1.000000e+00 : f32
    %28 = vector.broadcast %cst_12 : f32 to vector<2x1x256xf32>
    %29 = arith.subf %28, %23 : vector<2x1x256xf32>
    %cst_13 = arith.constant 0.000000e+00 : f32
    %30 = vector.broadcast %cst_13 : f32 to vector<2x1x256xf32>
    %31 = arith.maximumf %29, %30 : vector<2x1x256xf32>
    %32 = arith.mulf %31, %31 : vector<2x1x256xf32>
    %33 = arith.mulf %22, %27 : vector<2x1x256xf32>
    %34 = arith.mulf %32, %33 : vector<2x1x256xf32>
    %cst_14 = arith.constant 0.000000e+00 : f32
    %35 = vector.broadcast %cst_14 : f32 to vector<2x1x256xf32>
    %36 = arith.subf %35, %34 : vector<2x1x256xf32>
    %c0_15 = arith.constant 0 : index
    %c0_16 = arith.constant 0 : index
    %c0_17 = arith.constant 0 : index
    %37 = vector.load %arg6[%c0_15, %c0_16, %c0_17] : memref<2x1x256xf32, #tpu.memory_space<vmem>>, vector<2x1x256xf32>
    %38 = arith.addf %37, %36 : vector<2x1x256xf32>
    %c0_18 = arith.constant 0 : index
    %c0_19 = arith.constant 0 : index
    %c0_20 = arith.constant 0 : index
    %39 = vector.load %arg6[%c0_18, %c0_19, %c0_20] : memref<2x1x256xf32, #tpu.memory_space<vmem>>, vector<2x1x256xf32>
    tpu.vector_store %arg6[%c0_18, %c0_19, %c0_20], %38 {strides = array<i32>} : memref<2x1x256xf32, #tpu.memory_space<vmem>>, vector<2x1x256xf32>,
    %c0_i32_21 = arith.constant 0 : i32
    %40 = arith.cmpi eq, %arg1, %c0_i32_21 : i32
    %41 = arith.extui %40 : i1 to i32
    %c0_i32_22 = arith.constant 0 : i32
    %42 = arith.cmpi ne, %41, %c0_i32_22 : i32
    scf.if %42 {
      %c0_23 = arith.constant 0 : index
      %c0_24 = arith.constant 0 : index
      %c0_25 = arith.constant 0 : index
      %43 = vector.load %arg6[%c0_23, %c0_24, %c0_25] : memref<2x1x256xf32, #tpu.memory_space<vmem>>, vector<2x1x256xf32>
      %44 = vector.shape_cast %43 : vector<2x1x256xf32> to vector<1x2x1x256xf32>
      %cst_26 = arith.constant dense<0.000000e+00> : vector<1xf32>
      %45 = vector.multi_reduction <add>, %44, %cst_26 [1, 2, 3] : vector<1x2x1x256xf32> to vector<1xf32>
      %46 = vector.shape_cast %45 : vector<1xf32> to vector<1x1x1x1xf32>
      %47 = vector.extract %46[0, 0, 0, 0] : f32 from vector<1x1x1x1xf32>
      %48 = vector.broadcast %47 : f32 to vector<1x8x128xf32>
      %c0_27 = arith.constant 0 : index
      %c0_28 = arith.constant 0 : index
      %c0_29 = arith.constant 0 : index
      %49 = vector.load %arg5[%c0_27, %c0_28, %c0_29] : memref<1x8x128xf32, #tpu.memory_space<vmem>>, vector<1x8x128xf32>
      tpu.vector_store %arg5[%c0_27, %c0_28, %c0_29], %48 {strides = array<i32>} : memref<1x8x128xf32, #tpu.memory_space<vmem>>, vector<1x8x128xf32>,
    } else {
    }
    return
  }
  func.func @transform_0(%arg0: i32, %arg1: i32) -> (i32, i32, i32) {
    %c0_i32 = arith.constant 0 : i32
    %c0_i32_0 = arith.constant 0 : i32
    return %arg0, %c0_i32, %arg1 : i32, i32, i32
  }
  func.func @transform_1(%arg0: i32, %arg1: i32) -> (i32, i32, i32) {
    %c0_i32 = arith.constant 0 : i32
    %c0_i32_0 = arith.constant 0 : i32
    return %arg0, %c0_i32, %arg1 : i32, i32, i32
  }
  func.func @transform_2(%arg0: i32, %arg1: i32) -> (i32, i32, i32) {
    %c0_i32 = arith.constant 0 : i32
    %c0_i32_0 = arith.constant 0 : i32
    %c0_i32_1 = arith.constant 0 : i32
    %c0_i32_2 = arith.constant 0 : i32
    return %c0_i32, %c0_i32_0, %c0_i32_1 : i32, i32, i32
  }
  func.func @transform_3(%arg0: i32, %arg1: i32) -> (i32, i32, i32) {
    %c0_i32 = arith.constant 0 : i32
    %c0_i32_0 = arith.constant 0 : i32
    %c0_i32_1 = arith.constant 0 : i32
    return %arg0, %c0_i32, %c0_i32_0 : i32, i32, i32
  }
}

</mosaic_0001>

<bundles_post_ra>
// kernel: tpu_custom_call.1
= control target key start
LH: loop header
LB: loop body
LE: loop exit
PB: predicated region body
PF: predicated region fallthrough
CT: control target
= control target key end

     0   :  { %8 = vsyncpa [#allocation4], 0  ;;  %s592_s0 = inlined_call_operand.hbm [shape: f32[2,4,256], index: 0, kind: input, shape index: {}]   ;;  %s593_s1 = inlined_call_operand.vmem [shape: s32[2,1,256], index: 1, kind: input, shape index: {}]   ;;  %s594_s2 = inlined_call_operand.vmem [shape: f32[1,4,1], index: 2, kind: input, shape index: {}]   ;;  %s595_s3 = inlined_call_operand.hbm [shape: f32[1,8,128], index: 3, kind: output, shape index: {}]  }
   0x1   :  { %9 = vsyncpa [#allocation5], 0  ;;  %s469_s12 = smov [#allocation3]  }
   0x2   :  { %s15_s13 = sshll.u32 %s469_s12, 4  ;;  %s16_s13 = int_to_ptr.vmem [resolvable:$true] %s15_s13 }
   0x3   :  { %s433_s14 = scalar_lea.vmem %s16_s13, 256  ;;  %p438_p1 = scmp.lt.s32.totalorder %s16_s13, %s16_s13 }
   0x4   :  { %p434_p0 = scmp.ne.s32.totalorder %s16_s13, %s433_s14  ;;  %p439_p2 = scmp.lt.s32.totalorder %s433_s14, %s433_s14 }
   0x6   :  { %p440_p3 = por %p439_p2, %p438_p1 }
   0x8   :  { %p441_p4 = pnand %p440_p3, %p434_p0 }
   0xa   :  { %444 = shalt.err (!%p441_p4)
}
   0xb   :  { %s470_s15 = smov 128   ;;  %s471_s16 = smov 8  }
   0xc   :  { %21 = dma.hbm_to_vmem [thread:$0]  %s592_s0, 256, %s16_s13, [#allocation4], %s470_s15, %s470_s15, %s471_s16  }
   0xd   :  { %465 = dma.done.wait [#allocation4], 256  }
   0xe   :  { %466 = vsyncadd [#allocation4], 4294967040  ;;  %v33_v0 = vlaneseq  ;;  %v472_v1 = vmov 0   ;;  %v473_v4 = vmov 0.0   ;;  %vm50_vm1 = vcmask 1043456   ;;  %v39_v8 = vld [vmem:[#allocation3] sm:$0xff] }
   0xf   :  { %402 = vset.pattern.permute.xlu0 %v472_v1  ;;  %v43_v7 = vld [vmem:[%s594_s2] sm:$0xf]  ;;  %v40_v9 = vld [vmem:[#allocation3 + $0x8] sm:$0xff]  ;;  %v46_v12 = vcombine.high %v39_v8, %v39_v8  ;;  %v51_v14 = vsel %vm50_vm1, %v39_v8, -inf  ;;  %vm355_vm6 = vcmask 1040384  }
  0x10   :  { %vm499_vm0 = vcmp.lt.s32.totalorder %v33_v0, 256  ;;  %v503_v3 = vshrl.u32 %v33_v0, 7  ;;  %223 = vperm.xlu0 %402, %v43_v7   ;;  %v41_v10 = vld [vmem:[%s593_s1] sm:$0x3]  ;;  %v42_v11 = vld [vmem:[%s593_s1 + $0x2] sm:$0x3]  ;;  %v47_v13 = vcombine.high %v40_v9, %v40_v9 }
  0x11   :  { %37 = vst.msk [vmem:[#allocation2] sm:$0x3] %vm499_vm0, %v473_v4  ;;  %38 = vst.msk [vmem:[#allocation2 + $0x2] sm:$0x3] %vm499_vm0, %v473_v4  ;;  %v65_v15 = vsel %vm50_vm1, %v40_v9, -inf  ;;  %v52_v16 = vrot.slane %v51_v14, 4 }
  0x12   :  { %v510_v5 = vsub.s32 0, %v503_v3  ;;  %v513_v6 = vsub.s32 1, %v503_v3  ;;  %v66_v17 = vrot.slane %v65_v15, 4  ;;  %v58_v20 = vsel %vm50_vm1, %v46_v12, -inf  ;;  %s475_s1 = smov [#allocation6]  }
  0x13   :  { %v72_v21 = vsel %vm50_vm1, %v47_v13, -inf  ;;  %v53_v24 = vmax.f32 %v51_v14, %v52_v16  ;;  %v59_v25 = vrot.slane %v58_v20, 4  ;;  %s380_s2 = sshll.u32 %s475_s1, 4  ;;  %s381_s2 = int_to_ptr.vmem [resolvable:$true] %s380_s2 }
  0x14   :  { %v140_v18 = vrot.slane %v41_v10, %v510_v5  ;;  %v144_v19 = vrot.slane %v41_v10, %v513_v6  ;;  %v148_v22 = vrot.slane %v42_v11, %v510_v5  ;;  %v152_v23 = vrot.slane %v42_v11, %v513_v6  ;;  %s445_s25 = scalar_lea.vmem %s381_s2, 128  ;;  %p450_p6 = scmp.lt.s32.totalorder %s381_s2, %s381_s2 }
  0x15   :  { %v73_v26 = vrot.slane %v72_v21, 4  ;;  %v60_v27 = vmax.f32 %v58_v20, %v59_v25  ;;  %v67_v28 = vmax.f32 %v65_v15, %v66_v17  ;;  %v54_v34 = vrot.slane %v53_v24, 2  ;;  %p446_p5 = scmp.ne.s32.totalorder %s381_s2, %s445_s25  ;;  %p451_p7 = scmp.lt.s32.totalorder %s445_s25, %s445_s25 }
  0x16   :  { %vm153_vm2 = vcmp.eq.s32.totalorder %v503_v3, %v140_v18  ;;  %vm154_vm3 = vcmp.eq.s32.totalorder %v503_v3, %v144_v19  ;;  %vm155_vm4 = vcmp.eq.s32.totalorder %v503_v3, %v148_v22  ;;  %vm156_vm5 = vcmp.eq.s32.totalorder %v503_v3, %v152_v23 }
  0x17   :  { %v74_v29 = vmax.f32 %v72_v21, %v73_v26  ;;  %v536_v30 = vsel %vm153_vm2, 1.0, %v473_v4  ;;  %v538_v31 = vsel %vm154_vm3, 1.0, %v473_v4  ;;  %v540_v32 = vsel %vm155_vm4, 1.0, %v473_v4  ;;  %p452_p8 = por %p451_p7, %p450_p6 }
  0x18   :  { %v542_v33 = vsel %vm156_vm5, 1.0, %v473_v4  ;;  %v61_v35 = vrot.slane %v60_v27, 2  ;;  %v169_v36 = vcombine.low %v536_v30, %v538_v31  ;;  %v68_v38 = vrot.slane %v67_v28, 2 }
  0x19   :  { %v170_v37 = vcombine.low %v540_v32, %v542_v33  ;;  %v75_v39 = vrot.slane %v74_v29, 2  ;;  %v55_v40 = vmax.f32 %v53_v24, %v54_v34  ;;  %p453_p9 = pnand %p452_p8, %p446_p5 }
  0x1a   :  { %v62_v41 = vmax.f32 %v60_v27, %v61_v35  ;;  %v69_v42 = vmax.f32 %v67_v28, %v68_v38 }
  0x1b   :  { %v76_v43 = vmax.f32 %v74_v29, %v75_v39  ;;  %v56_v44 = vrot.slane %v55_v40, 1 }
  0x1c   :  { %v63_v45 = vrot.slane %v62_v41, 1  ;;  %v70_v46 = vrot.slane %v69_v42, 1 }
  0x1d   :  { %v77_v47 = vrot.slane %v76_v43, 1  ;;  %v57_v48 = vmax.f32 %v55_v40, %v56_v44 }
  0x1e   :  { %v64_v49 = vmax.f32 %v62_v41, %v63_v45  ;;  %v71_v50 = vmax.f32 %v69_v42, %v70_v46 }
  0x1f   :  { %v78_v51 = vmax.f32 %v76_v43, %v77_v47 }
  0x20   :  { %v83_v52 = vcombine.low %v57_v48, %v64_v49 }
  0x21   :  { %v84_v53 = vcombine.low %v71_v50, %v78_v51 }
  0x22   :  { %v87_v54 = vsub.f32 %v39_v8, %v83_v52 }
  0x23   :  { %v88_v55 = vsub.f32 %v40_v9, %v84_v53 }
  0x24   :  { %v89_v56 = vmul.f32 1.442695, %v87_v54  ;;  %v173_v18 = vmul.f32 %v169_v36, %v87_v54 }
  0x25   :  { %v91_v57 = vmul.f32 1.442695, %v88_v55  ;;  %v174_v20 = vmul.f32 %v170_v37, %v88_v55 }
  0x26   :  { %405 = vpow2.f32 %v89_v56  ;;  %v177_v24 = vcombine.high %v173_v18, %v173_v18  ;;  %v181_v28 = vsel %vm50_vm1, %v173_v18, 0.0 }
  0x27   :  { %407 = vpow2.f32 %v91_v57  ;;  %v178_v26 = vcombine.high %v174_v20, %v174_v20  ;;  %v195_v34 = vsel %vm50_vm1, %v174_v20, 0.0  ;;  %v182_v40 = vrot.slane %v181_v28, 4 }
  0x28   :  { %v188_v38 = vsel %vm50_vm1, %v177_v24, 0.0  ;;  %v196_v41 = vrot.slane %v195_v34, 4 }
  0x29   :  { %v202_v36 = vsel %vm50_vm1, %v178_v26, 0.0  ;;  %v189_v43 = vrot.slane %v188_v38, 4  ;;  %v183_v46 = vadd.f32 %v182_v40, %v181_v28 }
  0x2a   :  { %v203_v45 = vrot.slane %v202_v36, 4  ;;  %v197_v47 = vadd.f32 %v196_v41, %v195_v34 }
  0x2b   :  { %v190_v48 = vadd.f32 %v189_v43, %v188_v38  ;;  %v184_v50 = vrot.slane %v183_v46, 2 }
  0x2c   :  { %v204_v49 = vadd.f32 %v203_v45, %v202_v36  ;;  %v198_v51 = vrot.slane %v197_v47, 2 }
  0x2d   :  { %v191_v52 = vrot.slane %v190_v48, 2  ;;  %v185_v54 = vadd.f32 %v184_v50, %v183_v46 }
  0x2e   :  { %v205_v53 = vrot.slane %v204_v49, 2  ;;  %v199_v55 = vadd.f32 %v198_v51, %v197_v47 }
  0x2f   :  { %v192_v56 = vadd.f32 %v191_v52, %v190_v48 }
  0x30   :  { %v206_v57 = vadd.f32 %v205_v53, %v204_v49 }
  0x33   :  { %v406_v58 = vpop.eup %405 }
  0x34   :  { %v408_v59 = vpop.eup %407  ;;  %v95_v60 = vcombine.high %v406_v58, %v406_v58  ;;  %v99_v62 = vsel %vm50_vm1, %v406_v58, 0.0  ;;  %v186_v58 = vrot.slane %v185_v54, 1 }
  0x35   :  { %v96_v61 = vcombine.high %v408_v59, %v408_v59  ;;  %v113_v63 = vsel %vm50_vm1, %v408_v59, 0.0  ;;  %v100_v1 = vrot.slane %v99_v62, 4 }
  0x36   :  { %v106_v0 = vsel %vm50_vm1, %v95_v60, 0.0  ;;  %v114_v7 = vrot.slane %v113_v63, 4  ;;  %v200_v60 = vrot.slane %v199_v55, 1 }
  0x37   :  { %v120_v4 = vsel %vm50_vm1, %v96_v61, 0.0  ;;  %v107_v8 = vrot.slane %v106_v0, 4  ;;  %v101_v10 = vadd.f32 %v100_v1, %v99_v62  ;;  %v193_v62 = vrot.slane %v192_v56, 1 }
  0x38   :  { %v121_v9 = vrot.slane %v120_v4, 4  ;;  %v115_v11 = vadd.f32 %v114_v7, %v113_v63  ;;  %v187_v7 = vadd.f32 %v186_v58, %v185_v54 }
  0x39   :  { %v108_v12 = vadd.f32 %v107_v8, %v106_v0  ;;  %v102_v14 = vrot.slane %v101_v10, 2  ;;  %v207_v0 = vrot.slane %v206_v57, 1 }
  0x3a   :  { %v122_v13 = vadd.f32 %v121_v9, %v120_v4  ;;  %v116_v15 = vrot.slane %v115_v11, 2  ;;  %v201_v9 = vadd.f32 %v200_v60, %v199_v55 }
  0x3b   :  { %v109_v16 = vrot.slane %v108_v12, 2  ;;  %v103_v19 = vadd.f32 %v102_v14, %v101_v10 }
  0x3c   :  { %v123_v17 = vrot.slane %v122_v13, 2  ;;  %v117_v21 = vadd.f32 %v116_v15, %v115_v11  ;;  %v194_v11 = vadd.f32 %v193_v62, %v192_v56 }
  0x3d   :  { %v110_v22 = vadd.f32 %v109_v16, %v108_v12  ;;  %v104_v25 = vrot.slane %v103_v19, 1 }
  0x3e   :  { %v124_v23 = vadd.f32 %v123_v17, %v122_v13  ;;  %v118_v27 = vrot.slane %v117_v21, 1  ;;  %v208_v13 = vadd.f32 %v207_v0, %v206_v57 }
  0x3f   :  { %v111_v29 = vrot.slane %v110_v22, 1  ;;  %v105_v39 = vadd.f32 %v104_v25, %v103_v19 }
  0x40   :  { %v125_v35 = vrot.slane %v124_v23, 1  ;;  %v119_v37 = vadd.f32 %v118_v27, %v117_v21 }
  0x41   :  { %v112_v42 = vadd.f32 %v111_v29, %v110_v22  ;;  %409 = vlog2.f32 %v105_v39 }
  0x42   :  { %v126_v44 = vadd.f32 %v125_v35, %v124_v23  ;;  %411 = vlog2.f32 %v119_v37 }
  0x43   :  { %413 = vlog2.f32 %v112_v42 }
  0x44   :  { %415 = vlog2.f32 %v126_v44 }
  0x4e   :  { %v410_v59 = vpop.eup %409 }
  0x4f   :  { %v412_v61 = vpop.eup %411  ;;  %v128_v4 = vmul.f32 0.6931472, %v410_v59  ;;  %v474_v59 = vmov 1966171168  }
  0x50   :  { %v414_v63 = vpop.eup %413  ;;  %v132_v8 = vmul.f32 0.6931472, %v412_v61  ;;  %v290_v60 = vunpack.c.l.s4 %v474_v59 }
  0x51   :  { %v416_v1 = vpop.eup %415  ;;  %v130_v10 = vmul.f32 0.6931472, %v414_v63  ;;  %v556_v14 = vsub.f32 %v187_v7, %v128_v4 }
  0x52   :  { %v134_v12 = vmul.f32 0.6931472, %v416_v1  ;;  %v558_v15 = vsub.f32 %v201_v9, %v132_v8 }
  0x53   :  { %v560_v16 = vsub.f32 %v194_v11, %v130_v10  ;;  %v213_v18 = vmul.f32 1.442695, %v556_v14 }
  0x54   :  { %v562_v17 = vsub.f32 %v208_v13, %v134_v12  ;;  %v217_v19 = vmul.f32 1.442695, %v558_v15  ;;  %v291_v13 = vunpack.c.0.s8 %v290_v60 }
  0x55   :  { %v215_v20 = vmul.f32 1.442695, %v560_v16  ;;  %417 = vpow2.f32 %v213_v18 }
  0x56   :  { %v219_v21 = vmul.f32 1.442695, %v562_v17  ;;  %419 = vpow2.f32 %v217_v19 }
  0x57   :  { %421 = vpow2.f32 %v215_v20 }
  0x58   :  { %423 = vpow2.f32 %v219_v21 }
  0x62   :  { %v418_v22 = vpop.eup %417 }
  0x63   :  { %v420_v23 = vpop.eup %419 }
  0x64   :  { %v422_v25 = vpop.eup %421 }
  0x65   :  { %v424_v34 = vpop.eup %423  ;;  %v259_v43 = vsub.f32 1.0, %v422_v25 }
  0x66   :  { %v261_v44 = vsub.f32 1.0, %v424_v34 }
  0x67   :  { %v263_v52 = vmax.f32 %v259_v43, 0.0 }
  0x68   :  { %v265_v54 = vmax.f32 %v261_v44, 0.0 }
  0x69   :  { %v267_v4 = vmul.f32 %v263_v52, %v263_v52 }
  0x6a   :  { %v269_v8 = vmul.f32 %v265_v54, %v265_v54 }
  0x8b   :  { %v224_v24 = vpop.permute.xlu0 %223 }
  0x8c   :  { %v226_v26 = vmul.f32 %v536_v30, %v224_v24  ;;  %v227_v27 = vmul.f32 %v538_v31, %v224_v24  ;;  %v228_v28 = vmul.f32 %v540_v32, %v224_v24  ;;  %v229_v29 = vmul.f32 %v542_v33, %v224_v24 }
  0x8d   :  { %v258_v30 = vsub.f32 1.0, %v418_v22  ;;  %v260_v31 = vsub.f32 1.0, %v420_v23 }
  0x8e   :  { %v230_v35 = vsel %vm50_vm1, %v226_v26, 0.0  ;;  %v237_v38 = vsel %vm50_vm1, %v227_v27, 0.0  ;;  %v244_v39 = vsel %vm50_vm1, %v228_v28, 0.0  ;;  %v251_v40 = vsel %vm50_vm1, %v229_v29, 0.0 }
  0x8f   :  { %v231_v36 = vrot.slane %v230_v35, 4  ;;  %v238_v37 = vrot.slane %v237_v38, 4  ;;  %v245_v41 = vrot.slane %v244_v39, 4  ;;  %v252_v42 = vrot.slane %v251_v40, 4 }
  0x90   :  { %v262_v51 = vmax.f32 %v258_v30, 0.0  ;;  %v264_v53 = vmax.f32 %v260_v31, 0.0  ;;  %v294_v26 = vsub.s32 %v291_v13, %v503_v3 }
  0x91   :  { %v232_v32 = vadd.f32 %v231_v36, %v230_v35  ;;  %v239_v45 = vadd.f32 %v238_v37, %v237_v38  ;;  %v246_v33 = vadd.f32 %v245_v41, %v244_v39  ;;  %v253_v46 = vadd.f32 %v252_v42, %v251_v40  ;;  %v282_v40 = vld [vmem:[#allocation2] sm:$0x3] }
  0x92   :  { %v266_v1 = vmul.f32 %v262_v51, %v262_v51  ;;  %v268_v7 = vmul.f32 %v264_v53, %v264_v53 }
  0x93   :  { %v233_v47 = vrot.slane %v232_v32, 2  ;;  %v240_v48 = vrot.slane %v239_v45, 2  ;;  %v247_v49 = vrot.slane %v246_v33, 2  ;;  %v254_v50 = vrot.slane %v253_v46, 2 }
  0x95   :  { %v234_v55 = vadd.f32 %v233_v47, %v232_v32  ;;  %v241_v56 = vadd.f32 %v240_v48, %v239_v45  ;;  %v248_v57 = vadd.f32 %v247_v49, %v246_v33  ;;  %v255_v58 = vadd.f32 %v254_v50, %v253_v46 }
  0x97   :  { %v235_v61 = vrot.slane %v234_v55, 1  ;;  %v242_v62 = vrot.slane %v241_v56, 1  ;;  %v249_v63 = vrot.slane %v248_v57, 1  ;;  %v256_v0 = vrot.slane %v255_v58, 1 }
  0x99   :  { %v236_v9 = vadd.f32 %v235_v61, %v234_v55  ;;  %v243_v10 = vadd.f32 %v242_v62, %v241_v56  ;;  %v250_v11 = vadd.f32 %v249_v63, %v248_v57  ;;  %v257_v12 = vadd.f32 %v256_v0, %v255_v58 }
  0x9b   :  { %v270_v18 = vmul.f32 %v236_v9, %v556_v14  ;;  %v271_v19 = vmul.f32 %v243_v10, %v560_v16  ;;  %v272_v20 = vmul.f32 %v250_v11, %v558_v15  ;;  %v273_v21 = vmul.f32 %v257_v12, %v562_v17  ;;  %v283_v16 = vld [vmem:[#allocation2 + $0x2] sm:$0x3] }
  0x9d   :  { %v274_v22 = vmul.f32 %v270_v18, %v266_v1  ;;  %v275_v23 = vmul.f32 %v271_v19, %v267_v4  ;;  %v276_v24 = vmul.f32 %v272_v20, %v268_v7  ;;  %v277_v25 = vmul.f32 %v273_v21, %v269_v8 }
  0x9f   :  { %v278_v27 = vsub.f32 0.0, %v274_v22  ;;  %v279_v28 = vsub.f32 0.0, %v275_v23  ;;  %v280_v29 = vsub.f32 0.0, %v276_v24  ;;  %v281_v34 = vsub.f32 0.0, %v277_v25 }
  0xa1   :  { %v288_v35 = vcombine.low %v278_v27, %v279_v28  ;;  %v303_v38 = vcombine.low %v280_v29, %v281_v34 }
  0xa3   :  { %v295_v39 = vrot.slane %v288_v35, %v294_v26  ;;  %v310_v14 = vrot.slane %v303_v38, %v294_v26 }
  0xa5   :  { %v302_v36 = vrot.slane %v295_v39, %v294_v26  ;;  %v317_v15 = vrot.slane %v310_v14, %v294_v26 }
  0xa7   :  { %v320_v37 = vadd.f32 %v302_v36, %v282_v40  ;;  %v321_v17 = vadd.f32 %v317_v15, %v283_v16 }
  0xa9   :  { %326 = vst.msk [vmem:[#allocation2] sm:$0x3] %vm499_vm0, %v320_v37  ;;  %327 = vst.msk [vmem:[#allocation2 + $0x2] sm:$0x3] %vm499_vm0, %v321_v17 }
  0xb0   :  { %v331_v3 = vld [vmem:[#allocation2] sm:$0x3]  ;;  %v332_v41 = vld [vmem:[#allocation2 + $0x2] sm:$0x3] }
  0xb1   :  { %v338_v42 = vrot.slane %v331_v3, %v510_v5  ;;  %v342_v30 = vrot.slane %v331_v3, %v513_v6  ;;  %v346_v43 = vrot.slane %v332_v41, %v510_v5  ;;  %v350_v31 = vrot.slane %v332_v41, %v513_v6 }
  0xb3   :  { %v356_v44 = vsel %vm355_vm6, %v338_v42, 0.0  ;;  %v357_v32 = vsel %vm355_vm6, %v342_v30, 0.0  ;;  %v359_v33 = vsel %vm355_vm6, %v346_v43, 0.0  ;;  %v361_v47 = vsel %vm355_vm6, %v350_v31, 0.0 }
  0xb4   :  { %v358_v45 = vadd.f32 %v357_v32, %v356_v44 }
  0xb6   :  { %v360_v46 = vadd.f32 %v359_v33, %v358_v45 }
  0xb8   :  { %v362_v48 = vadd.f32 %v361_v47, %v360_v46 }
  0xba   :  { %363 = vadd.xlane.f32.xlu0 %v362_v48 }
 0x143   :  { %v364_v2 = vpop.xlane.xlu0 %363 }
 0x144   :  { %v365_v49 = vrot.slane %v364_v2, 4 }
 0x146   :  { %v366_v50 = vadd.f32 %v365_v49, %v364_v2 }
 0x148   :  { %v367_v51 = vrot.slane %v366_v50, 2 }
 0x14a   :  { %v368_v52 = vadd.f32 %v367_v51, %v366_v50 }
 0x14c   :  { %v369_v53 = vrot.slane %v368_v52, 1 }
 0x14e   :  { %v370_v54 = vadd.f32 %v369_v53, %v368_v52 }
 0x150   :  { %393 = vpush %v370_v54 }
 0x181   :  { %s394_s24 = spop %393 }
 0x182   :  { %v372_v5 = vstv %s394_s24 }
 0x183   :  { %373 = vst [vmem:[#allocation6] sm:$0xff] %v372_v5 }
 0x184   :  { %456 = shalt.err (!%p453_p9)
}
 0x185   :  { %383 = dma.vmem_to_hbm [thread:$0]  %s381_s2, 128, %s595_s3, [#allocation5]  }
 0x186   :  { %467 = dma.done.wait [#allocation5], 128  }
 0x187   :  { %468 = vsyncadd [#allocation5], 4294967168 }
 0x188   :  { %387 = vsyncpa [#allocation4], 1 }
 0x189   :  { %388 = vsyncpa [#allocation5], 1 }

</bundles_post_ra>
